<compile_context>
chip_gen: v7x
topology: tpu7x:2x2x1
jax: 0.10.0
libtpu: 0.0.40
codegen_flags: <defaults>
</compile_context>

<pallas_src>
import jax
import jax.numpy as jnp
from jax.experimental import pallas as pl
from jax.experimental.pallas import tpu as pltpu

M = 119      # length of every polyphase plane of the intermediate activations
NPH = 16     # polyphase factor of the input / conv1 output
L_IN = 2048  # input length implied by Linear(119): (2048 - 144) / 2**4 = 119


def _shift_right_zero(block):
    # out[:, m] = block[:, m-1], zero at m == 0   (conv left zero-pad)
    return jnp.concatenate(
        [jnp.zeros((block.shape[0], 1), block.dtype), block[:, :-1]], axis=1)


def _shift_left_zero(block):
    # out[:, m] = block[:, m+1], zero at m == last (conv right zero-pad)
    return jnp.concatenate(
        [block[:, 1:], jnp.zeros((block.shape[0], 1), block.dtype)], axis=1)


def _extend(a, cin):
    """a: (Q*cin, M) phase-major activation -> ((Q+2)*cin, M).

    Prepends the last phase block shifted by -1 and appends the first phase
    block shifted by +1, so every output phase of the next stride-2 conv reads
    one contiguous row-slab of 4*cin rows.
    """
    lo = _shift_right_zero(a[-cin:, :])
    hi = _shift_left_zero(a[:cin, :])
    return jnp.concatenate([lo, a, hi], axis=0)


def _stride2_conv(a_prev, w_mat, *, cin, p_out):
    """One Conv1d(cin->cout, K=4, stride=2, pad=1) in polyphase form.

    a_prev: (2*p_out*cin, M) f32, rows ordered (input_phase, channel).
    w_mat : (cout, 4*cin) bf16, columns ordered (k, channel).
    Returns (p_out*cout, M) f32, rows ordered (output_phase, channel).
    """
    e = _extend(a_prev, cin)                       # ((2*p_out + 2)*cin, M)
    outs = []
    for p in range(p_out):
        slab = e[2 * p * cin:(2 * p + 4) * cin, :].astype(jnp.bfloat16)
        outs.append(jnp.dot(w_mat, slab, preferred_element_type=jnp.float32))
    return outs[0] if p_out == 1 else jnp.concatenate(outs, axis=0)


def _disc_kernel(xph_ref, w1e_ref, w2m_ref, w3m_ref, w4m_ref, w5m_ref,
                 linw_ref, linb_ref, o_ref):
    # xph_ref: (1, 16, 128), xph[q, i] = x[16*i + q] for one sample.
    xv = xph_ref[0]                                              # (16, 128) f32
    # conv1 (1->8, K=145, stride 1): X2[16c+q, m] = x[16(m+c)+q], built from 10
    # contiguous slices of xv, then one matmul with the phase-expanded weight.
    x2 = jnp.concatenate([xv[:, c:c + M] for c in range(10)], axis=0)  # (160,M)
    a1 = jnp.dot(w1e_ref[...], x2.astype(jnp.bfloat16),
                 preferred_element_type=jnp.float32)             # (128, M)
    # conv2..conv5 (K=4, stride 2, pad 1) in polyphase form (all VMEM-resident).
    a2 = _stride2_conv(a1, w2m_ref[...], cin=8, p_out=8)         # (128, M)
    a3 = _stride2_conv(a2, w3m_ref[...], cin=16, p_out=4)        # (128, M)
    a4 = _stride2_conv(a3, w4m_ref[...], cin=32, p_out=2)        # (128, M)
    a5 = _stride2_conv(a4, w5m_ref[...], cin=64, p_out=1)        # (1, M)
    # Linear(119 -> 1) + Sigmoid, kept in f32 (v5e has no bf16 VPU/EUP).
    logit = jnp.sum(a5 * linw_ref[...], axis=-1, keepdims=True) + linb_ref[...]
    o_ref[0] = jax.nn.sigmoid(logit).astype(o_ref.dtype)


def _prep_weights(params):
    """Re-lay out conv weights for the polyphase matmuls (bf16 MXU operands)."""
    w1 = params["w1"]                                    # (8, 1, 145)
    # W1e[p*8 + co, p + k] = w1[co, 0, k]  ->  (128, 160)
    w1e = jnp.zeros((NPH * 8, NPH + 144), jnp.float32)
    for p in range(NPH):
        w1e = w1e.at[p * 8:(p + 1) * 8, p:p + 145].set(w1[:, 0, :])

    def mat(w):  # (Cout, Cin, K) -> (Cout, K*Cin), columns ordered (k, ci)
        return jnp.transpose(w, (0, 2, 1)).reshape(w.shape[0], -1)

    return (w1e.astype(jnp.bfloat16),
            mat(params["w2"]).astype(jnp.bfloat16),      # (16, 32)
            mat(params["w3"]).astype(jnp.bfloat16),      # (32, 64)
            mat(params["w4"]).astype(jnp.bfloat16),      # (64, 128)
            mat(params["w5"]).astype(jnp.bfloat16),      # (1, 256)
            params["lin_w"].astype(jnp.float32),         # (1, 119)
            params["lin_b"].astype(jnp.float32))         # (1, 1)


def discriminator_forward(params, x):
    B = x.shape[0]
    assert x.shape[1:] == (1, L_IN), "Linear(119, 1) forces input length 2048"
    # 16-way polyphase split of the raw input (bytes-neutral relayout in XLA;
    # no im2col and no intermediate activation ever touches HBM).
    xph = x.reshape(B, L_IN // NPH, NPH).transpose(0, 2, 1)      # (B, 16, 128)
    w1e, w2m, w3m, w4m, w5m, lin_w, lin_b = _prep_weights(params)

    return pl.pallas_call(
        _disc_kernel,
        out_shape=jax.ShapeDtypeStruct((B, 1, 1), jnp.float32),
        grid=(B,),
        in_specs=[
            pl.BlockSpec((1, NPH, L_IN // NPH), lambda b: (b, 0, 0)),
            pl.BlockSpec(w1e.shape, lambda b: (0, 0)),
            pl.BlockSpec(w2m.shape, lambda b: (0, 0)),
            pl.BlockSpec(w3m.shape, lambda b: (0, 0)),
            pl.BlockSpec(w4m.shape, lambda b: (0, 0)),
            pl.BlockSpec(w5m.shape, lambda b: (0, 0)),
            pl.BlockSpec(lin_w.shape, lambda b: (0, 0)),
            pl.BlockSpec(lin_b.shape, lambda b: (0, 0)),
        ],
        out_specs=pl.BlockSpec((1, 1, 1), lambda b: (b, 0, 0)),
        compiler_params=pltpu.CompilerParams(
            dimension_semantics=("parallel",)),
    )(xph, w1e, w2m, w3m, w4m, w5m, lin_w, lin_b)


def init_params(key, nc=1, ndf=8):
    keys = jax.random.split(key, 7)

    def conv_w(k, cout, cin, ksz):
        return 0.02 * jax.random.normal(k, (cout, cin, ksz), dtype=jnp.float32)

    return {
        "w1": conv_w(keys[0], ndf, nc, 145),
        "w2": conv_w(keys[1], ndf * 2, ndf, 4),
        "w3": conv_w(keys[2], ndf * 4, ndf * 2, 4),
        "w4": conv_w(keys[3], ndf * 8, ndf * 4, 4),
        "w5": conv_w(keys[4], nc, ndf * 8, 4),
        "lin_w": 0.05 * jax.random.normal(keys[5], (1, 119), dtype=jnp.float32),
        "lin_b": 0.05 * jax.random.normal(keys[6], (1, 1), dtype=jnp.float32),
    }


if __name__ == "__main__":
    key = jax.random.PRNGKey(0)
    pkey, xkey = jax.random.split(key)
    params = init_params(pkey)

    # Input length 2048 is dictated by Linear(119): (2048 - 144) / 2^4 = 119.
    x = jax.random.normal(xkey, (2, 1, 2048), dtype=jnp.float32)

    out = jax.jit(discriminator_forward)(params, x)
    out = jax.block_until_ready(out)
    assert out.shape == (2, 1, 1)
    assert bool(jnp.all((out >= 0.0) & (out <= 1.0)))
    print("KERNEL_OK")
</pallas_src>

<mosaic_0001>
module attributes {stable_mosaic.version = 11 : i64} {
  func.func @_disc_kernel(%arg0: i32, %arg1: memref<1x16x128xf32, #tpu.memory_space<vmem>>, %arg2: memref<128x160xbf16, #tpu.memory_space<vmem>>, %arg3: memref<16x32xbf16, #tpu.memory_space<vmem>>, %arg4: memref<32x64xbf16, #tpu.memory_space<vmem>>, %arg5: memref<64x128xbf16, #tpu.memory_space<vmem>>, %arg6: memref<1x256xbf16, #tpu.memory_space<vmem>>, %arg7: memref<1x119xf32, #tpu.memory_space<vmem>>, %arg8: memref<1x1xf32, #tpu.memory_space<vmem>>, %arg9: memref<1x1x1xf32, #tpu.memory_space<vmem>>) attributes {dimension_semantics = [#tpu.dimension_semantics<parallel>], iteration_bounds = array<i64: 2>, scalar_prefetch = 0 : i64, scratch_operands = 0 : i64, tpu.core_type = #tpu.core_type<tc>, window_params = [{transform_indices = @transform_0, window_bounds = array<i64: 1, 16, 128>}, {pipeline_mode = #tpu.pipeline_mode<synchronous>, transform_indices = @transform_1, window_bounds = array<i64: 128, 160>}, {pipeline_mode = #tpu.pipeline_mode<synchronous>, transform_indices = @transform_2, window_bounds = array<i64: 16, 32>}, {pipeline_mode = #tpu.pipeline_mode<synchronous>, transform_indices = @transform_3, window_bounds = array<i64: 32, 64>}, {pipeline_mode = #tpu.pipeline_mode<synchronous>, transform_indices = @transform_4, window_bounds = array<i64: 64, 128>}, {pipeline_mode = #tpu.pipeline_mode<synchronous>, transform_indices = @transform_5, window_bounds = array<i64: 1, 256>}, {pipeline_mode = #tpu.pipeline_mode<synchronous>, transform_indices = @transform_6, window_bounds = array<i64: 1, 119>}, {pipeline_mode = #tpu.pipeline_mode<synchronous>, transform_indices = @transform_7, window_bounds = array<i64: 1, 1>}, {transform_indices = @transform_8, window_bounds = array<i64: 1, 1, 1>}]} {
    %c0 = arith.constant 0 : index
    %c0_0 = arith.constant 0 : index
    %c0_1 = arith.constant 0 : index
    %0 = vector.load %arg1[%c0, %c0_0, %c0_1] : memref<1x16x128xf32, #tpu.memory_space<vmem>>, vector<1x16x128xf32>
    %1 = vector.shape_cast %0 : vector<1x16x128xf32> to vector<16x128xf32>
    %2 = vector.extract_strided_slice %1 {offsets = [0, 0], sizes = [16, 119], strides = [1, 1]} : vector<16x128xf32> to vector<16x119xf32>
    %3 = vector.extract_strided_slice %1 {offsets = [0, 1], sizes = [16, 119], strides = [1, 1]} : vector<16x128xf32> to vector<16x119xf32>
    %4 = vector.extract_strided_slice %1 {offsets = [0, 2], sizes = [16, 119], strides = [1, 1]} : vector<16x128xf32> to vector<16x119xf32>
    %5 = vector.extract_strided_slice %1 {offsets = [0, 3], sizes = [16, 119], strides = [1, 1]} : vector<16x128xf32> to vector<16x119xf32>
    %6 = vector.extract_strided_slice %1 {offsets = [0, 4], sizes = [16, 119], strides = [1, 1]} : vector<16x128xf32> to vector<16x119xf32>
    %7 = vector.extract_strided_slice %1 {offsets = [0, 5], sizes = [16, 119], strides = [1, 1]} : vector<16x128xf32> to vector<16x119xf32>
    %8 = vector.extract_strided_slice %1 {offsets = [0, 6], sizes = [16, 119], strides = [1, 1]} : vector<16x128xf32> to vector<16x119xf32>
    %9 = vector.extract_strided_slice %1 {offsets = [0, 7], sizes = [16, 119], strides = [1, 1]} : vector<16x128xf32> to vector<16x119xf32>
    %10 = vector.extract_strided_slice %1 {offsets = [0, 8], sizes = [16, 119], strides = [1, 1]} : vector<16x128xf32> to vector<16x119xf32>
    %11 = vector.extract_strided_slice %1 {offsets = [0, 9], sizes = [16, 119], strides = [1, 1]} : vector<16x128xf32> to vector<16x119xf32>
    %12 = tpu.concatenate %2, %3, %4, %5, %6, %7, %8, %9, %10, %11 in 0 : vector<16x119xf32>, vector<16x119xf32>, vector<16x119xf32>, vector<16x119xf32>, vector<16x119xf32>, vector<16x119xf32>, vector<16x119xf32>, vector<16x119xf32>, vector<16x119xf32>, vector<16x119xf32> -> vector<160x119xf32>
    %c0_2 = arith.constant 0 : index
    %c0_3 = arith.constant 0 : index
    %13 = vector.load %arg2[%c0_2, %c0_3] : memref<128x160xbf16, #tpu.memory_space<vmem>>, vector<128x160xbf16>
    %14 = arith.truncf %12 : vector<160x119xf32> to vector<160x119xbf16>
    %cst = arith.constant dense<0.000000e+00> : vector<128x119xf32>
    %15 = tpu.matmul %13, %14, %cst {dimension_numbers = #tpu.dot_dimension_numbers<[1], [0], [0], [1], [0, 0, 1, 1], [], []>} : vector<128x160xbf16>, vector<160x119xbf16>, vector<128x119xf32> -> vector<128x119xf32>
    %c0_4 = arith.constant 0 : index
    %c0_5 = arith.constant 0 : index
    %16 = vector.load %arg3[%c0_4, %c0_5] : memref<16x32xbf16, #tpu.memory_space<vmem>>, vector<16x32xbf16>
    %17 = vector.extract_strided_slice %15 {offsets = [120, 0], sizes = [8, 119], strides = [1, 1]} : vector<128x119xf32> to vector<8x119xf32>
    %cst_6 = arith.constant 0.000000e+00 : f32
    %18 = vector.broadcast %cst_6 : f32 to vector<8x1xf32>
    %19 = vector.extract_strided_slice %17 {offsets = [0, 0], sizes = [8, 118], strides = [1, 1]} : vector<8x119xf32> to vector<8x118xf32>
    %20 = tpu.concatenate %18, %19 in 1 : vector<8x1xf32>, vector<8x118xf32> -> vector<8x119xf32>
    %21 = vector.extract_strided_slice %15 {offsets = [0, 0], sizes = [8, 119], strides = [1, 1]} : vector<128x119xf32> to vector<8x119xf32>
    %22 = vector.extract_strided_slice %21 {offsets = [0, 1], sizes = [8, 118], strides = [1, 1]} : vector<8x119xf32> to vector<8x118xf32>
    %cst_7 = arith.constant 0.000000e+00 : f32
    %23 = vector.broadcast %cst_7 : f32 to vector<8x1xf32>
    %24 = tpu.concatenate %22, %23 in 1 : vector<8x118xf32>, vector<8x1xf32> -> vector<8x119xf32>
    %25 = tpu.concatenate %20, %15, %24 in 0 : vector<8x119xf32>, vector<128x119xf32>, vector<8x119xf32> -> vector<144x119xf32>
    %26 = vector.extract_strided_slice %25 {offsets = [0, 0], sizes = [32, 119], strides = [1, 1]} : vector<144x119xf32> to vector<32x119xf32>
    %27 = arith.truncf %26 : vector<32x119xf32> to vector<32x119xbf16>
    %cst_8 = arith.constant dense<0.000000e+00> : vector<16x119xf32>
    %28 = tpu.matmul %16, %27, %cst_8 {dimension_numbers = #tpu.dot_dimension_numbers<[1], [0], [0], [1], [0, 0, 1, 1], [], []>} : vector<16x32xbf16>, vector<32x119xbf16>, vector<16x119xf32> -> vector<16x119xf32>
    %29 = vector.extract_strided_slice %25 {offsets = [16, 0], sizes = [32, 119], strides = [1, 1]} : vector<144x119xf32> to vector<32x119xf32>
    %30 = arith.truncf %29 : vector<32x119xf32> to vector<32x119xbf16>
    %cst_9 = arith.constant dense<0.000000e+00> : vector<16x119xf32>
    %31 = tpu.matmul %16, %30, %cst_9 {dimension_numbers = #tpu.dot_dimension_numbers<[1], [0], [0], [1], [0, 0, 1, 1], [], []>} : vector<16x32xbf16>, vector<32x119xbf16>, vector<16x119xf32> -> vector<16x119xf32>
    %32 = vector.extract_strided_slice %25 {offsets = [32, 0], sizes = [32, 119], strides = [1, 1]} : vector<144x119xf32> to vector<32x119xf32>
    %33 = arith.truncf %32 : vector<32x119xf32> to vector<32x119xbf16>
    %cst_10 = arith.constant dense<0.000000e+00> : vector<16x119xf32>
    %34 = tpu.matmul %16, %33, %cst_10 {dimension_numbers = #tpu.dot_dimension_numbers<[1], [0], [0], [1], [0, 0, 1, 1], [], []>} : vector<16x32xbf16>, vector<32x119xbf16>, vector<16x119xf32> -> vector<16x119xf32>
    %35 = vector.extract_strided_slice %25 {offsets = [48, 0], sizes = [32, 119], strides = [1, 1]} : vector<144x119xf32> to vector<32x119xf32>
    %36 = arith.truncf %35 : vector<32x119xf32> to vector<32x119xbf16>
    %cst_11 = arith.constant dense<0.000000e+00> : vector<16x119xf32>
    %37 = tpu.matmul %16, %36, %cst_11 {dimension_numbers = #tpu.dot_dimension_numbers<[1], [0], [0], [1], [0, 0, 1, 1], [], []>} : vector<16x32xbf16>, vector<32x119xbf16>, vector<16x119xf32> -> vector<16x119xf32>
    %38 = vector.extract_strided_slice %25 {offsets = [64, 0], sizes = [32, 119], strides = [1, 1]} : vector<144x119xf32> to vector<32x119xf32>
    %39 = arith.truncf %38 : vector<32x119xf32> to vector<32x119xbf16>
    %cst_12 = arith.constant dense<0.000000e+00> : vector<16x119xf32>
    %40 = tpu.matmul %16, %39, %cst_12 {dimension_numbers = #tpu.dot_dimension_numbers<[1], [0], [0], [1], [0, 0, 1, 1], [], []>} : vector<16x32xbf16>, vector<32x119xbf16>, vector<16x119xf32> -> vector<16x119xf32>
    %41 = vector.extract_strided_slice %25 {offsets = [80, 0], sizes = [32, 119], strides = [1, 1]} : vector<144x119xf32> to vector<32x119xf32>
    %42 = arith.truncf %41 : vector<32x119xf32> to vector<32x119xbf16>
    %cst_13 = arith.constant dense<0.000000e+00> : vector<16x119xf32>
    %43 = tpu.matmul %16, %42, %cst_13 {dimension_numbers = #tpu.dot_dimension_numbers<[1], [0], [0], [1], [0, 0, 1, 1], [], []>} : vector<16x32xbf16>, vector<32x119xbf16>, vector<16x119xf32> -> vector<16x119xf32>
    %44 = vector.extract_strided_slice %25 {offsets = [96, 0], sizes = [32, 119], strides = [1, 1]} : vector<144x119xf32> to vector<32x119xf32>
    %45 = arith.truncf %44 : vector<32x119xf32> to vector<32x119xbf16>
    %cst_14 = arith.constant dense<0.000000e+00> : vector<16x119xf32>
    %46 = tpu.matmul %16, %45, %cst_14 {dimension_numbers = #tpu.dot_dimension_numbers<[1], [0], [0], [1], [0, 0, 1, 1], [], []>} : vector<16x32xbf16>, vector<32x119xbf16>, vector<16x119xf32> -> vector<16x119xf32>
    %47 = vector.extract_strided_slice %25 {offsets = [112, 0], sizes = [32, 119], strides = [1, 1]} : vector<144x119xf32> to vector<32x119xf32>
    %48 = arith.truncf %47 : vector<32x119xf32> to vector<32x119xbf16>
    %cst_15 = arith.constant dense<0.000000e+00> : vector<16x119xf32>
    %49 = tpu.matmul %16, %48, %cst_15 {dimension_numbers = #tpu.dot_dimension_numbers<[1], [0], [0], [1], [0, 0, 1, 1], [], []>} : vector<16x32xbf16>, vector<32x119xbf16>, vector<16x119xf32> -> vector<16x119xf32>
    %50 = tpu.concatenate %28, %31, %34, %37, %40, %43, %46, %49 in 0 : vector<16x119xf32>, vector<16x119xf32>, vector<16x119xf32>, vector<16x119xf32>, vector<16x119xf32>, vector<16x119xf32>, vector<16x119xf32>, vector<16x119xf32> -> vector<128x119xf32>
    %c0_16 = arith.constant 0 : index
    %c0_17 = arith.constant 0 : index
    %51 = vector.load %arg4[%c0_16, %c0_17] : memref<32x64xbf16, #tpu.memory_space<vmem>>, vector<32x64xbf16>
    %52 = vector.extract_strided_slice %50 {offsets = [112, 0], sizes = [16, 119], strides = [1, 1]} : vector<128x119xf32> to vector<16x119xf32>
    %cst_18 = arith.constant 0.000000e+00 : f32
    %53 = vector.broadcast %cst_18 : f32 to vector<16x1xf32>
    %54 = vector.extract_strided_slice %52 {offsets = [0, 0], sizes = [16, 118], strides = [1, 1]} : vector<16x119xf32> to vector<16x118xf32>
    %55 = tpu.concatenate %53, %54 in 1 : vector<16x1xf32>, vector<16x118xf32> -> vector<16x119xf32>
    %56 = vector.extract_strided_slice %50 {offsets = [0, 0], sizes = [16, 119], strides = [1, 1]} : vector<128x119xf32> to vector<16x119xf32>
    %57 = vector.extract_strided_slice %56 {offsets = [0, 1], sizes = [16, 118], strides = [1, 1]} : vector<16x119xf32> to vector<16x118xf32>
    %cst_19 = arith.constant 0.000000e+00 : f32
    %58 = vector.broadcast %cst_19 : f32 to vector<16x1xf32>
    %59 = tpu.concatenate %57, %58 in 1 : vector<16x118xf32>, vector<16x1xf32> -> vector<16x119xf32>
    %60 = tpu.concatenate %55, %50, %59 in 0 : vector<16x119xf32>, vector<128x119xf32>, vector<16x119xf32> -> vector<160x119xf32>
    %61 = vector.extract_strided_slice %60 {offsets = [0, 0], sizes = [64, 119], strides = [1, 1]} : vector<160x119xf32> to vector<64x119xf32>
    %62 = arith.truncf %61 : vector<64x119xf32> to vector<64x119xbf16>
    %cst_20 = arith.constant dense<0.000000e+00> : vector<32x119xf32>
    %63 = tpu.matmul %51, %62, %cst_20 {dimension_numbers = #tpu.dot_dimension_numbers<[1], [0], [0], [1], [0, 0, 1, 1], [], []>} : vector<32x64xbf16>, vector<64x119xbf16>, vector<32x119xf32> -> vector<32x119xf32>
    %64 = vector.extract_strided_slice %60 {offsets = [32, 0], sizes = [64, 119], strides = [1, 1]} : vector<160x119xf32> to vector<64x119xf32>
    %65 = arith.truncf %64 : vector<64x119xf32> to vector<64x119xbf16>
    %cst_21 = arith.constant dense<0.000000e+00> : vector<32x119xf32>
    %66 = tpu.matmul %51, %65, %cst_21 {dimension_numbers = #tpu.dot_dimension_numbers<[1], [0], [0], [1], [0, 0, 1, 1], [], []>} : vector<32x64xbf16>, vector<64x119xbf16>, vector<32x119xf32> -> vector<32x119xf32>
    %67 = vector.extract_strided_slice %60 {offsets = [64, 0], sizes = [64, 119], strides = [1, 1]} : vector<160x119xf32> to vector<64x119xf32>
    %68 = arith.truncf %67 : vector<64x119xf32> to vector<64x119xbf16>
    %cst_22 = arith.constant dense<0.000000e+00> : vector<32x119xf32>
    %69 = tpu.matmul %51, %68, %cst_22 {dimension_numbers = #tpu.dot_dimension_numbers<[1], [0], [0], [1], [0, 0, 1, 1], [], []>} : vector<32x64xbf16>, vector<64x119xbf16>, vector<32x119xf32> -> vector<32x119xf32>
    %70 = vector.extract_strided_slice %60 {offsets = [96, 0], sizes = [64, 119], strides = [1, 1]} : vector<160x119xf32> to vector<64x119xf32>
    %71 = arith.truncf %70 : vector<64x119xf32> to vector<64x119xbf16>
    %cst_23 = arith.constant dense<0.000000e+00> : vector<32x119xf32>
    %72 = tpu.matmul %51, %71, %cst_23 {dimension_numbers = #tpu.dot_dimension_numbers<[1], [0], [0], [1], [0, 0, 1, 1], [], []>} : vector<32x64xbf16>, vector<64x119xbf16>, vector<32x119xf32> -> vector<32x119xf32>
    %73 = tpu.concatenate %63, %66, %69, %72 in 0 : vector<32x119xf32>, vector<32x119xf32>, vector<32x119xf32>, vector<32x119xf32> -> vector<128x119xf32>
    %c0_24 = arith.constant 0 : index
    %c0_25 = arith.constant 0 : index
    %74 = vector.load %arg5[%c0_24, %c0_25] : memref<64x128xbf16, #tpu.memory_space<vmem>>, vector<64x128xbf16>
    %75 = vector.extract_strided_slice %73 {offsets = [96, 0], sizes = [32, 119], strides = [1, 1]} : vector<128x119xf32> to vector<32x119xf32>
    %cst_26 = arith.constant 0.000000e+00 : f32
    %76 = vector.broadcast %cst_26 : f32 to vector<32x1xf32>
    %77 = vector.extract_strided_slice %75 {offsets = [0, 0], sizes = [32, 118], strides = [1, 1]} : vector<32x119xf32> to vector<32x118xf32>
    %78 = tpu.concatenate %76, %77 in 1 : vector<32x1xf32>, vector<32x118xf32> -> vector<32x119xf32>
    %79 = vector.extract_strided_slice %73 {offsets = [0, 0], sizes = [32, 119], strides = [1, 1]} : vector<128x119xf32> to vector<32x119xf32>
    %80 = vector.extract_strided_slice %79 {offsets = [0, 1], sizes = [32, 118], strides = [1, 1]} : vector<32x119xf32> to vector<32x118xf32>
    %cst_27 = arith.constant 0.000000e+00 : f32
    %81 = vector.broadcast %cst_27 : f32 to vector<32x1xf32>
    %82 = tpu.concatenate %80, %81 in 1 : vector<32x118xf32>, vector<32x1xf32> -> vector<32x119xf32>
    %83 = tpu.concatenate %78, %73, %82 in 0 : vector<32x119xf32>, vector<128x119xf32>, vector<32x119xf32> -> vector<192x119xf32>
    %84 = vector.extract_strided_slice %83 {offsets = [0, 0], sizes = [128, 119], strides = [1, 1]} : vector<192x119xf32> to vector<128x119xf32>
    %85 = arith.truncf %84 : vector<128x119xf32> to vector<128x119xbf16>
    %cst_28 = arith.constant dense<0.000000e+00> : vector<64x119xf32>
    %86 = tpu.matmul %74, %85, %cst_28 {dimension_numbers = #tpu.dot_dimension_numbers<[1], [0], [0], [1], [0, 0, 1, 1], [], []>} : vector<64x128xbf16>, vector<128x119xbf16>, vector<64x119xf32> -> vector<64x119xf32>
    %87 = vector.extract_strided_slice %83 {offsets = [64, 0], sizes = [128, 119], strides = [1, 1]} : vector<192x119xf32> to vector<128x119xf32>
    %88 = arith.truncf %87 : vector<128x119xf32> to vector<128x119xbf16>
    %cst_29 = arith.constant dense<0.000000e+00> : vector<64x119xf32>
    %89 = tpu.matmul %74, %88, %cst_29 {dimension_numbers = #tpu.dot_dimension_numbers<[1], [0], [0], [1], [0, 0, 1, 1], [], []>} : vector<64x128xbf16>, vector<128x119xbf16>, vector<64x119xf32> -> vector<64x119xf32>
    %90 = tpu.concatenate %86, %89 in 0 : vector<64x119xf32>, vector<64x119xf32> -> vector<128x119xf32>
    %c0_30 = arith.constant 0 : index
    %c0_31 = arith.constant 0 : index
    %91 = vector.load %arg6[%c0_30, %c0_31] : memref<1x256xbf16, #tpu.memory_space<vmem>>, vector<1x256xbf16>
    %92 = vector.extract_strided_slice %90 {offsets = [64, 0], sizes = [64, 119], strides = [1, 1]} : vector<128x119xf32> to vector<64x119xf32>
    %cst_32 = arith.constant 0.000000e+00 : f32
    %93 = vector.broadcast %cst_32 : f32 to vector<64x1xf32>
    %94 = vector.extract_strided_slice %92 {offsets = [0, 0], sizes = [64, 118], strides = [1, 1]} : vector<64x119xf32> to vector<64x118xf32>
    %95 = tpu.concatenate %93, %94 in 1 : vector<64x1xf32>, vector<64x118xf32> -> vector<64x119xf32>
    %96 = vector.extract_strided_slice %90 {offsets = [0, 0], sizes = [64, 119], strides = [1, 1]} : vector<128x119xf32> to vector<64x119xf32>
    %97 = vector.extract_strided_slice %96 {offsets = [0, 1], sizes = [64, 118], strides = [1, 1]} : vector<64x119xf32> to vector<64x118xf32>
    %cst_33 = arith.constant 0.000000e+00 : f32
    %98 = vector.broadcast %cst_33 : f32 to vector<64x1xf32>
    %99 = tpu.concatenate %97, %98 in 1 : vector<64x118xf32>, vector<64x1xf32> -> vector<64x119xf32>
    %100 = tpu.concatenate %95, %90, %99 in 0 : vector<64x119xf32>, vector<128x119xf32>, vector<64x119xf32> -> vector<256x119xf32>
    %101 = arith.truncf %100 : vector<256x119xf32> to vector<256x119xbf16>
    %cst_34 = arith.constant dense<0.000000e+00> : vector<1x119xf32>
    %102 = tpu.matmul %91, %101, %cst_34 {dimension_numbers = #tpu.dot_dimension_numbers<[1], [0], [0], [1], [0, 0, 1, 1], [], []>} : vector<1x256xbf16>, vector<256x119xbf16>, vector<1x119xf32> -> vector<1x119xf32>
    %c0_35 = arith.constant 0 : index
    %c0_36 = arith.constant 0 : index
    %103 = vector.load %arg7[%c0_35, %c0_36] : memref<1x119xf32, #tpu.memory_space<vmem>>, vector<1x119xf32>
    %104 = arith.mulf %102, %103 : vector<1x119xf32>
    %cst_37 = arith.constant dense<0.000000e+00> : vector<1xf32>
    %105 = vector.multi_reduction <add>, %104, %cst_37 [1] : vector<1x119xf32> to vector<1xf32>
    %106 = vector.shape_cast %105 : vector<1xf32> to vector<1x1xf32>
    %c0_38 = arith.constant 0 : index
    %c0_39 = arith.constant 0 : index
    %107 = vector.load %arg8[%c0_38, %c0_39] : memref<1x1xf32, #tpu.memory_space<vmem>>, vector<1x1xf32>
    %108 = arith.addf %106, %107 : vector<1x1xf32>
    %109 = arith.negf %108 : vector<1x1xf32>
    %110 = math.exp %109 : vector<1x1xf32>
    %cst_40 = arith.constant 1.000000e+00 : f32
    %111 = vector.broadcast %cst_40 : f32 to vector<1x1xf32>
    %112 = arith.addf %111, %110 : vector<1x1xf32>
    %113 = arith.divf %111, %112 : vector<1x1xf32>
    %c0_41 = arith.constant 0 : index
    %c0_42 = arith.constant 0 : index
    %c0_43 = arith.constant 0 : index
    %114 = vector.load %arg9[%c0_41, %c0_42, %c0_43] : memref<1x1x1xf32, #tpu.memory_space<vmem>>, vector<1x1x1xf32>
    %115 = vector.shape_cast %114 : vector<1x1x1xf32> to vector<1x1xf32>
    %116 = vector.shape_cast %113 : vector<1x1xf32> to vector<1x1x1xf32>
    tpu.vector_store %arg9[%c0_41, %c0_42, %c0_43], %116 {strides = array<i32>} : memref<1x1x1xf32, #tpu.memory_space<vmem>>, vector<1x1x1xf32>,
    return
  }
  func.func @transform_0(%arg0: i32) -> (i32, i32, i32) {
    %c0_i32 = arith.constant 0 : i32
    %c0_i32_0 = arith.constant 0 : i32
    %c0_i32_1 = arith.constant 0 : i32
    return %arg0, %c0_i32, %c0_i32_0 : i32, i32, i32
  }
  func.func @transform_1(%arg0: i32) -> (i32, i32) {
    %c0_i32 = arith.constant 0 : i32
    %c0_i32_0 = arith.constant 0 : i32
    %c0_i32_1 = arith.constant 0 : i32
    return %c0_i32, %c0_i32_0 : i32, i32
  }
  func.func @transform_2(%arg0: i32) -> (i32, i32) {
    %c0_i32 = arith.constant 0 : i32
    %c0_i32_0 = arith.constant 0 : i32
    %c0_i32_1 = arith.constant 0 : i32
    return %c0_i32, %c0_i32_0 : i32, i32
  }
  func.func @transform_3(%arg0: i32) -> (i32, i32) {
    %c0_i32 = arith.constant 0 : i32
    %c0_i32_0 = arith.constant 0 : i32
    %c0_i32_1 = arith.constant 0 : i32
    return %c0_i32, %c0_i32_0 : i32, i32
  }
  func.func @transform_4(%arg0: i32) -> (i32, i32) {
    %c0_i32 = arith.constant 0 : i32
    %c0_i32_0 = arith.constant 0 : i32
    %c0_i32_1 = arith.constant 0 : i32
    return %c0_i32, %c0_i32_0 : i32, i32
  }
  func.func @transform_5(%arg0: i32) -> (i32, i32) {
    %c0_i32 = arith.constant 0 : i32
    %c0_i32_0 = arith.constant 0 : i32
    %c0_i32_1 = arith.constant 0 : i32
    return %c0_i32, %c0_i32_0 : i32, i32
  }
  func.func @transform_6(%arg0: i32) -> (i32, i32) {
    %c0_i32 = arith.constant 0 : i32
    %c0_i32_0 = arith.constant 0 : i32
    %c0_i32_1 = arith.constant 0 : i32
    return %c0_i32, %c0_i32_0 : i32, i32
  }
  func.func @transform_7(%arg0: i32) -> (i32, i32) {
    %c0_i32 = arith.constant 0 : i32
    %c0_i32_0 = arith.constant 0 : i32
    %c0_i32_1 = arith.constant 0 : i32
    return %c0_i32, %c0_i32_0 : i32, i32
  }
  func.func @transform_8(%arg0: i32) -> (i32, i32, i32) {
    %c0_i32 = arith.constant 0 : i32
    %c0_i32_0 = arith.constant 0 : i32
    %c0_i32_1 = arith.constant 0 : i32
    return %arg0, %c0_i32, %c0_i32_0 : i32, i32, i32
  }
}

</mosaic_0001>

<bundles_post_ra>
// kernel: discriminator_forward.1
= control target key start
LH: loop header
LB: loop body
LE: loop exit
PB: predicated region body
PF: predicated region fallthrough
CT: control target
= control target key end

     0   :  { %s2248_s29 = smov 0   ;;  %s2533_s0 = inlined_call_operand.vmem [shape: f32[2,16,128], index: 0, kind: input, shape index: {}]   ;;  %s2534_s1 = inlined_call_operand.vmem [shape: bf16[128,160], index: 1, kind: input, shape index: {}]   ;;  %s2535_s2 = inlined_call_operand.vmem [shape: bf16[16,32], index: 2, kind: input, shape index: {}]   ;;  %s2536_s3 = inlined_call_operand.vmem [shape: bf16[32,64], index: 3, kind: input, shape index: {}]   ;;  %s2537_s4 = inlined_call_operand.vmem [shape: bf16[64,128], index: 4, kind: input, shape index: {}]   ;;  %s2538_s5 = inlined_call_operand.vmem [shape: bf16[1,256], index: 5, kind: input, shape index: {}]   ;;  %s2539_s6 = inlined_call_operand.vmem [shape: f32[1,119], index: 6, kind: input, shape index: {}]   ;;  %s2540_s7 = inlined_call_operand.<no memory space> [shape: f32[1,1], index: 7, kind: input, shape index: {}]   ;;  %s2541_s8 = inlined_call_operand.vmem [shape: f32[2,1,1], index: 8, kind: output, shape index: {}]  }
   0x1   :  { %v13_v0 = vstv %s2540_s7 }
   0x2   :  { %14 = vst [vmem:[#allocation2] sm:$0x1] %v13_v0 }
   0x3 LB: > { %s1628_s30 = sadd.s32 4294967295, %s2183_s29   ;;  %p1632_p0 = scmp.ge.s32.totalorder %s2183_s29, 1  ;;  %s2183_s29 = sphi %s2248_s29, %s20_s29  }
   0x4   : > { %p264_p1 = scmp.lt.s32.totalorder %s2183_s29, 3 }
   0x6   : > { %p265_p2 = pnand %p1632_p0, %p264_p1 }
   0x7   : > { %p296_p3 = scmp.lt.s32.totalorder (!%p265_p2), %s1628_s30, 1  ;;  %v2185_v1 = vmov (!%p265_p2), 0   ;;  %s2186_s12 = smov (!%p265_p2), 127   ;;  %v2144_v6 = vld [vmem:[%s2534_s1 + $0x4] ss:$8 sps:$4 sm:$0xff] (!%p265_p2)   ;;  %vm461_vm0 = vcmask (!%p265_p2), 261120  }
   0x8   : > { %268 = sbr.rel (%p265_p2) target bundleno = 2117 (0x845), region = 52  ;;  %486 = vmatprep.subr.bf16.mxu0 (!%p265_p2), %v2185_v1  ;;  %s2187_s13 = smov (!%p265_p2), 125   ;;  %1651 = vmatprep.mubr.msk.bf16.mxu0 (!%p265_p2), %vm461_vm0, %v2144_v6  ;;  %v2142_v43 = vld [vmem:[%s2534_s1] ss:$8 sps:$4 sm:$0xff] (!%p265_p2)   ;;  %v2145_v44 = vld [vmem:[%s2534_s1 + $0x14] ss:$8 sps:$4 sm:$0xff] (!%p265_p2)  }
   0x9   : > { %s2188_s14 = smov (!%p265_p2), 126   ;;  %s2189_s15 = smov (!%p265_p2), 124   ;;  %v2147_v45 = vld [vmem:[%s2534_s1 + $0x10] ss:$8 sps:$4 sm:$0xff] (!%p265_p2)   ;;  %v2148_v46 = vld [vmem:[%s2534_s1 + $0x24] ss:$8 sps:$4 sm:$0xff] (!%p265_p2)  }
   0xa   : > { %s2190_s16 = smov (!%p265_p2), 123   ;;  %s2191_s17 = smov (!%p265_p2), 122   ;;  %v2150_v47 = vld [vmem:[%s2534_s1 + $0x20] ss:$8 sps:$4 sm:$0xff] (!%p265_p2)   ;;  %v2151_v48 = vld [vmem:[%s2534_s1 + $0x34] ss:$8 sps:$4 sm:$0xff] (!%p265_p2)  }
   0xb   : > { %s2192_s18 = smov (!%p265_p2), 121   ;;  %s2193_s19 = smov (!%p265_p2), 120   ;;  %v2153_v49 = vld [vmem:[%s2534_s1 + $0x30] ss:$8 sps:$4 sm:$0xff] (!%p265_p2)   ;;  %v2154_v50 = vld [vmem:[%s2534_s1 + $0x44] ss:$8 sps:$4 sm:$0xff] (!%p265_p2)  }
   0xc   : > { %s2194_s20 = smov (!%p265_p2), 119   ;;  %v2156_v51 = vld [vmem:[%s2534_s1 + $0x40] ss:$8 sps:$4 sm:$0xff] (!%p265_p2)   ;;  %v2157_v52 = vld [vmem:[%s2534_s1 + $0x54] ss:$8 sps:$4 sm:$0xff] (!%p265_p2)   ;;  %vm2196_vm1 = vmmov (!%p265_p2), 0  }
   0xd   : > { %v2159_v53 = vld [vmem:[%s2534_s1 + $0x50] ss:$8 sps:$4 sm:$0xff] (!%p265_p2)   ;;  %v2160_v54 = vld [vmem:[%s2534_s1 + $0x64] ss:$8 sps:$4 sm:$0xff] (!%p265_p2)   ;;  %v2162_v55 = vld [vmem:[%s2534_s1 + $0x60] ss:$8 sps:$4 sm:$0xff] (!%p265_p2)  }
   0xe   : > { %v2163_v56 = vld [vmem:[%s2534_s1 + $0x74] ss:$8 sps:$4 sm:$0xff] (!%p265_p2)   ;;  %v2165_v57 = vld [vmem:[%s2534_s1 + $0x70] ss:$8 sps:$4 sm:$0xff] (!%p265_p2)   ;;  %vm589_vm2 = vcmask (!%p265_p2), 7168   ;;  %vm2198_vm4 = vmmov (!%p265_p2), 1  }
   0xf   : > { %s2549_s30 = smov (!%p296_p3, %s1628_s30), 1  ;;  %vm2334_vm3 = vmneg %vm589_vm2  ;;  %vm595_vm6 = vcmask 965632   ;;  %vm980_vm8 = vcmask 523264   ;;  %vm1567_vm11 = vcmask 966656   ;;  %vm1579_vm12 = vcmask 0  }
  0x10   : > { %s1749_s7 = sshll.u32 %s2549_s30, 4  ;;  %vm1661_vm5 = vmpackc.low %vm2198_vm4, %vm2334_vm3 }
  0x11   : > { %s300_s11 = scalar_lea.vmem %s2533_s0, %s1749_s7  ;;  %vm1671_vm7 = vmpackc.low %vm595_vm6, %vm2198_vm4 }
  0x12   : > { %v305_v2 = vld [vmem:[%s300_s11] sm:$0xff]  ;;  %v306_v3 = vld [vmem:[%s300_s11 + $0x8] sm:$0xff]  ;;  %vm2399_vm9 = vmpackc.low %vm2334_vm3, %vm2334_vm3 }
  0x13   : > { %v2027_v4 = vpack.i.bf16 %v306_v3, %v305_v2  ;;  %v379_v5 = vpack.c.bf16 %v306_v3, %v305_v2  ;;  %vm2417_vm10 = vmpackc.low %vm595_vm6, %vm595_vm6 }
  0x15   : > { %2028 = vrot.lane.b32.xlu0 %v2027_v4, %s2186_s12  ;;  %2038 = vrot.lane.b32.xlu1 %v2027_v4, %s2187_s13  ;;  %s2197_s13 = smov 1  }
  0x16   : > { %487 = vmatpush1.bf16.msra.mxu0 %v379_v5 }
  0x17   : > { %488 = vmatprep.subr.bf16.mxu0 %v2185_v1 }
  0x19   : > { %2033 = vrot.lane.b32.xlu0 %v2027_v4, %s2188_s14  ;;  %2043 = vrot.lane.b32.xlu1 %v2027_v4, %s2189_s15 }
  0x1d   : > { %2048 = vrot.lane.b32.xlu0 %v2027_v4, %s2190_s16  ;;  %2053 = vrot.lane.b32.xlu1 %v2027_v4, %s2191_s17 }
  0x21   : > { %2058 = vrot.lane.b32.xlu0 %v2027_v4, %s2192_s18  ;;  %2063 = vrot.lane.b32.xlu1 %v2027_v4, %s2193_s19 }
  0x25   : > { %2068 = vrot.lane.b32.xlu0 %v2027_v4, %s2194_s20 }
  0x87   : > { %v2029_v7 = vpop.permute.xlu0 %2028  ;;  %v2039_v8 = vpop.permute.xlu1 %2038 }
  0x88   : > { %v2031_v9 = vunpack.i.h.bf16 %v2029_v7  ;;  %v2030_v10 = vunpack.i.l.bf16 %v2029_v7  ;;  %v2041_v15 = vunpack.i.h.bf16 %v2039_v8  ;;  %v2040_v16 = vunpack.i.l.bf16 %v2039_v8 }
  0x8a   : > { %v380_v11 = vpack.c.bf16 %v2031_v9, %v2030_v10  ;;  %v382_v19 = vpack.c.bf16 %v2041_v15, %v2040_v16 }
  0x8b   : > { %v2034_v12 = vpop.permute.xlu0 %2033  ;;  %v2044_v17 = vpop.permute.xlu1 %2043 }
  0x8c   : > { %v2036_v13 = vunpack.i.h.bf16 %v2034_v12  ;;  %v2035_v14 = vunpack.i.l.bf16 %v2034_v12  ;;  %489 = vmatpush1.bf16.msra.mxu0 %v380_v11  ;;  %v2046_v20 = vunpack.i.h.bf16 %v2044_v17  ;;  %v2045_v21 = vunpack.i.l.bf16 %v2044_v17 }
  0x8d   : > { %490 = vmatprep.subr.bf16.mxu0 %v2185_v1 }
  0x8e   : > { %v381_v18 = vpack.c.bf16 %v2036_v13, %v2035_v14  ;;  %v383_v23 = vpack.c.bf16 %v2046_v20, %v2045_v21 }
  0x8f   : > { %v2049_v22 = vpop.permute.xlu0 %2048  ;;  %v2054_v26 = vpop.permute.xlu1 %2053 }
  0x90   : > { %491 = vmatpush1.bf16.msra.mxu0 %v381_v18  ;;  %v2051_v24 = vunpack.i.h.bf16 %v2049_v22  ;;  %v2050_v25 = vunpack.i.l.bf16 %v2049_v22  ;;  %v2056_v28 = vunpack.i.h.bf16 %v2054_v26  ;;  %v2055_v29 = vunpack.i.l.bf16 %v2054_v26 }
  0x91   : > { %492 = vmatprep.subr.bf16.mxu0 %v2185_v1 }
  0x92   : > { %v384_v27 = vpack.c.bf16 %v2051_v24, %v2050_v25  ;;  %v385_v31 = vpack.c.bf16 %v2056_v28, %v2055_v29 }
  0x93   : > { %v2059_v30 = vpop.permute.xlu0 %2058  ;;  %v2064_v34 = vpop.permute.xlu1 %2063 }
  0x94   : > { %493 = vmatpush1.bf16.msra.mxu0 %v382_v19  ;;  %v2061_v32 = vunpack.i.h.bf16 %v2059_v30  ;;  %v2060_v33 = vunpack.i.l.bf16 %v2059_v30  ;;  %v2066_v36 = vunpack.i.h.bf16 %v2064_v34  ;;  %v2065_v37 = vunpack.i.l.bf16 %v2064_v34 }
  0x95   : > { %494 = vmatprep.subr.bf16.mxu0 %v2185_v1 }
  0x96   : > { %v386_v35 = vpack.c.bf16 %v2061_v32, %v2060_v33  ;;  %v387_v39 = vpack.c.bf16 %v2066_v36, %v2065_v37  ;;  %v2166_v37 = vld [vmem:[%s2535_s2] sm:$0xff]  }
  0x97   : > { %v2069_v38 = vpop.permute.xlu0 %2068 }
  0x98   : > { %495 = vmatpush1.bf16.msra.mxu0 %v383_v23  ;;  %v2071_v40 = vunpack.i.h.bf16 %v2069_v38  ;;  %v2070_v41 = vunpack.i.l.bf16 %v2069_v38  ;;  %v2195_v23 = vmov 0.0  }
  0x99   : > { %496 = vmatprep.subr.bf16.mxu0 %v2185_v1  ;;  %1844 = vmatprep.subr.bf16.mxu1 %v2195_v23 }
  0x9a   : > { %v388_v42 = vpack.c.bf16 %v2071_v40, %v2070_v41  ;;  %1848 = vmatprep.mubr.msk.bf16.mxu1 %vm2196_vm1, %v2195_v23 }
  0x9c   : > { %497 = vmatpush1.bf16.msra.mxu0 %v384_v27 }
  0x9d   : > { %498 = vmatprep.subr.bf16.mxu0 %v2185_v1 }
  0xa0   : > { %499 = vmatpush1.bf16.msra.mxu0 %v385_v31 }
  0xa1   : > { %500 = vmatprep.subr.bf16.mxu0 %v2185_v1 }
  0xa4   : > { %501 = vmatpush1.bf16.msra.mxu0 %v386_v35 }
  0xa5   : > { %502 = vmatprep.subr.bf16.mxu0 %v2185_v1 }
  0xa8   : > { %503 = vmatpush1.bf16.msra.mxu0 %v387_v39 }
  0xa9   : > { %504 = vmatprep.subr.bf16.mxu0 %v2185_v1 }
  0xac   : > { %505 = vmatpush1.bf16.msra.mxu0 %v388_v42 }
  0xaf   : > { %519 = vmatmul.mubr.bf16.vlgmr.msra.gmra.mrb[0].mxu0 %v2142_v43 }
  0xb0   : > { %1652 = vmatprep.mubr.msk.bf16.mxu0 %vm461_vm0, %v2145_v44 }
  0xb7   : > { %527 = vmatmul.mubr.bf16.gmra.mrb[4].mxu0 %v2147_v45 }
  0xb8   : > { %1653 = vmatprep.mubr.msk.bf16.mxu0 %vm461_vm0, %v2148_v46 }
  0xbf   : > { %535 = vmatmul.mubr.bf16.gmra.mrb[8].mxu0 %v2150_v47 }
  0xc0   : > { %1654 = vmatprep.mubr.msk.bf16.mxu0 %vm461_vm0, %v2151_v48 }
  0xc7   : > { %543 = vmatmul.mubr.bf16.gmra.mrb[12].mxu0 %v2153_v49 }
  0xc8   : > { %1655 = vmatprep.mubr.msk.bf16.mxu0 %vm461_vm0, %v2154_v50 }
  0xcf   : > { %551 = vmatmul.mubr.bf16.gmra.mrb[16].mxu0 %v2156_v51 }
  0xd0   : > { %1656 = vmatprep.mubr.msk.bf16.mxu0 %vm461_vm0, %v2157_v52 }
  0xd7   : > { %559 = vmatmul.mubr.bf16.gmra.mrb[20].mxu0 %v2159_v53 }
  0xd8   : > { %1657 = vmatprep.mubr.msk.bf16.mxu0 %vm461_vm0, %v2160_v54 }
  0xdf   : > { %567 = vmatmul.mubr.bf16.gmra.mrb[24].mxu0 %v2162_v55 }
  0xe0   : > { %1658 = vmatprep.mubr.msk.bf16.mxu0 %vm461_vm0, %v2163_v56 }
  0xe7   : > { %575 = vmatmul.mubr.bf16.gmra.mrb[28].mxu0 %v2165_v57 }
 0x182   : > { %v520_v58 = vpop.f32.mrb[0].mxu0 }
 0x183   : > { %592 = vrot.lane.b32.xlu0 %v520_v58, %s2186_s12  ;;  %v522_v59 = vpop.f32.mrb[1].mxu0 }
 0x184   : > { %v523_v60 = vpop.f32.mrb[2].mxu0 }
 0x185   : > { %v525_v61 = vpop.f32.mrb[3].mxu0 }
 0x18a   : > { %v528_v62 = vpop.f32.mrb[4].mxu0 }
 0x18b   : > { %v598_v63 = vpack.c.bf16 %v528_v62, %v523_v60  ;;  %v530_v0 = vpop.f32.mrb[5].mxu0 }
 0x18c   : > { %v531_v1 = vpop.f32.mrb[6].mxu0 }
 0x18d   : > { %v533_v2 = vpop.f32.mrb[7].mxu0 }
 0x192   : > { %v536_v3 = vpop.f32.mrb[8].mxu0 }
 0x193   : > { %v648_v4 = vpack.c.bf16 %v536_v3, %v531_v1  ;;  %v538_v5 = vpop.f32.mrb[9].mxu0 }
 0x194   : > { %v539_v6 = vpop.f32.mrb[10].mxu0 }
 0x195   : > { %v541_v7 = vpop.f32.mrb[11].mxu0 }
 0x19a   : > { %v544_v8 = vpop.f32.mrb[12].mxu0 }
 0x19b   : > { %v690_v9 = vpack.c.bf16 %v544_v8, %v539_v6  ;;  %v546_v10 = vpop.f32.mrb[13].mxu0 }
 0x19c   : > { %v547_v11 = vpop.f32.mrb[14].mxu0 }
 0x19d   : > { %v549_v12 = vpop.f32.mrb[15].mxu0 }
 0x1a2   : > { %v552_v13 = vpop.f32.mrb[16].mxu0 }
 0x1a3   : > { %v732_v14 = vpack.c.bf16 %v552_v13, %v547_v11  ;;  %v554_v15 = vpop.f32.mrb[17].mxu0 }
 0x1a4   : > { %v555_v16 = vpop.f32.mrb[18].mxu0 }
 0x1a5   : > { %v557_v17 = vpop.f32.mrb[19].mxu0 }
 0x1aa   : > { %v560_v18 = vpop.f32.mrb[20].mxu0 }
 0x1ab   : > { %v774_v19 = vpack.c.bf16 %v560_v18, %v555_v16  ;;  %v562_v20 = vpop.f32.mrb[21].mxu0  ;;  %v2167_v18 = vld [vmem:[%s2536_s3] sm:$0xff]  }
 0x1ac   : > { %v563_v21 = vpop.f32.mrb[22].mxu0  ;;  %1940 = vmatprep.mubr.msk.bf16.mxu0 %vm980_vm8, %v2167_v18 }
 0x1ad   : > { %v565_v22 = vpop.f32.mrb[23].mxu0 }
 0x1b2   : > { %v568_v24 = vpop.f32.mrb[24].mxu0 }
 0x1b3   : > { %v816_v25 = vpack.c.bf16 %v568_v24, %v563_v21  ;;  %v570_v26 = vpop.f32.mrb[25].mxu0 }
 0x1b4   : > { %v571_v27 = vpop.f32.mrb[26].mxu0 }
 0x1b5   : > { %v573_v28 = vpop.f32.mrb[27].mxu0 }
 0x1ba   : > { %v576_v29 = vpop.f32.mrb[28].mxu0 }
 0x1bb   : > { %v858_v30 = vpack.c.bf16 %v576_v29, %v571_v27  ;;  %v578_v31 = vpop.f32.mrb[29].mxu0 }
 0x1bc   : > { %v579_v32 = vpop.f32.mrb[30].mxu0 }
 0x1bd   : > { %586 = vrot.lane.b32.xlu1 %v579_v32, %s2197_s13  ;;  %v581_v33 = vpop.f32.mrb[31].mxu0 }
 0x1f5   : > { %v593_v38 = vpop.permute.xlu0 %592 }
 0x1f6   : > { %v1672_v39 = vpack.c.bf16 %v593_v38, %v579_v32 }
 0x22f   : > { %v587_v35 = vpop.permute.xlu1 %586 }
 0x230   : > { %v1662_v36 = vpack.c.bf16 %v520_v58, %v587_v35 }
 0x232   : > { %1845 = vmatpush3.bf16.msk.msra.mxu1 %vm1661_vm5, %v1662_v36 }
 0x233   : > { %1846 = vmatprep.subr.bf16.mxu1 %v2195_v23 }
 0x236   : > { %1847 = vmatpush3.bf16.msra.mxu1 %v598_v63 }
 0x237   : > { %1852 = vmatprep.subr.bf16.mxu1 %v2195_v23 }
 0x239   : > { %1849 = vmatmul.mubr.msk.bf16.vlgmr.msra.gmra.mrb[0].mxu1 %vm461_vm0, %v2166_v37 }
 0x23a   : > { %1853 = vmatpush3.bf16.msra.mxu1 %v598_v63  ;;  %1856 = vmatprep.mubr.msk.bf16.mxu1 %vm2196_vm1, %v2195_v23 }
 0x23b   : > { %1854 = vmatprep.subr.bf16.mxu1 %v2195_v23 }
 0x23e   : > { %1855 = vmatpush3.bf16.msra.mxu1 %v648_v4 }
 0x23f   : > { %1860 = vmatprep.subr.bf16.mxu1 %v2195_v23 }
 0x241   : > { %1857 = vmatmul.mubr.msk.bf16.vlgmr.msra.gmra.mrb[4].mxu1 %vm461_vm0, %v2166_v37 }
 0x242   : > { %1861 = vmatpush3.bf16.msra.mxu1 %v648_v4  ;;  %1864 = vmatprep.mubr.msk.bf16.mxu1 %vm2196_vm1, %v2195_v23 }
 0x243   : > { %1862 = vmatprep.subr.bf16.mxu1 %v2195_v23 }
 0x246   : > { %1863 = vmatpush3.bf16.msra.mxu1 %v690_v9 }
 0x247   : > { %1868 = vmatprep.subr.bf16.mxu1 %v2195_v23 }
 0x249   : > { %1865 = vmatmul.mubr.msk.bf16.vlgmr.msra.gmra.mrb[8].mxu1 %vm461_vm0, %v2166_v37 }
 0x24a   : > { %1869 = vmatpush3.bf16.msra.mxu1 %v690_v9  ;;  %1872 = vmatprep.mubr.msk.bf16.mxu1 %vm2196_vm1, %v2195_v23 }
 0x24b   : > { %1870 = vmatprep.subr.bf16.mxu1 %v2195_v23 }
 0x24e   : > { %1871 = vmatpush3.bf16.msra.mxu1 %v732_v14 }
 0x24f   : > { %1876 = vmatprep.subr.bf16.mxu1 %v2195_v23 }
 0x251   : > { %1873 = vmatmul.mubr.msk.bf16.vlgmr.msra.gmra.mrb[12].mxu1 %vm461_vm0, %v2166_v37 }
 0x252   : > { %1877 = vmatpush3.bf16.msra.mxu1 %v732_v14  ;;  %1880 = vmatprep.mubr.msk.bf16.mxu1 %vm2196_vm1, %v2195_v23 }
 0x253   : > { %1878 = vmatprep.subr.bf16.mxu1 %v2195_v23 }
 0x256   : > { %1879 = vmatpush3.bf16.msra.mxu1 %v774_v19 }
 0x257   : > { %1884 = vmatprep.subr.bf16.mxu1 %v2195_v23 }
 0x259   : > { %1881 = vmatmul.mubr.msk.bf16.vlgmr.msra.gmra.mrb[16].mxu1 %vm461_vm0, %v2166_v37 }
 0x25a   : > { %1885 = vmatpush3.bf16.msra.mxu1 %v774_v19  ;;  %1888 = vmatprep.mubr.msk.bf16.mxu1 %vm2196_vm1, %v2195_v23  ;;  %v2168_v19 = vld [vmem:[%s2536_s3 + $0x8] sm:$0xff]  }
 0x25b   : > { %1886 = vmatprep.subr.bf16.mxu1 %v2195_v23 }
 0x25e   : > { %1887 = vmatpush3.bf16.msra.mxu1 %v816_v25 }
 0x25f   : > { %1892 = vmatprep.subr.bf16.mxu1 %v2195_v23 }
 0x261   : > { %1889 = vmatmul.mubr.msk.bf16.vlgmr.msra.gmra.mrb[20].mxu1 %vm461_vm0, %v2166_v37 }
 0x262   : > { %1893 = vmatpush3.bf16.msra.mxu1 %v816_v25  ;;  %1896 = vmatprep.mubr.msk.bf16.mxu1 %vm2196_vm1, %v2195_v23 }
 0x263   : > { %1894 = vmatprep.subr.bf16.mxu1 %v2195_v23 }
 0x266   : > { %1895 = vmatpush3.bf16.msra.mxu1 %v858_v30 }
 0x267   : > { %1900 = vmatprep.subr.bf16.mxu1 %v2195_v23 }
 0x269   : > { %1897 = vmatmul.mubr.msk.bf16.vlgmr.msra.gmra.mrb[24].mxu1 %vm461_vm0, %v2166_v37 }
 0x26a   : > { %1901 = vmatpush3.bf16.msra.mxu1 %v858_v30  ;;  %1904 = vmatprep.mubr.msk.bf16.mxu1 %vm2196_vm1, %v2195_v23 }
 0x26b   : > { %1902 = vmatprep.subr.bf16.mxu1 %v2195_v23 }
 0x26e   : > { %1903 = vmatpush3.bf16.msk.msra.mxu1 %vm1671_vm7, %v1672_v39 }
 0x271   : > { %1905 = vmatmul.mubr.msk.bf16.vlgmr.msra.gmra.mrb[28].mxu1 %vm461_vm0, %v2166_v37 }
 0x272   : > { %1916 = vmatprep.mubr.msk.bf16.mxu1 %vm980_vm8, %v2167_v18 }
 0x30c   : > { %v641_v40 = vpop.f32.mrb[0].mxu1 }
 0x30d   : > { %v1850_v41 = vpop.f32.mrb[1].mxu1 }
 0x30e   : > { %v644_v42 = vpop.f32.mrb[2].mxu1 }
 0x30f   : > { %v2077_v43 = vpack.i.bf16 %v644_v42, %v641_v40  ;;  %v967_v44 = vpack.c.bf16 %v644_v42, %v641_v40  ;;  %v1851_v45 = vpop.f32.mrb[3].mxu1 }
 0x311   : > { %2078 = vrot.lane.b32.xlu0 %v2077_v43, %s2186_s12 }
 0x314   : > { %v683_v46 = vpop.f32.mrb[4].mxu1 }
 0x315   : > { %v1858_v47 = vpop.f32.mrb[5].mxu1 }
 0x316   : > { %v686_v48 = vpop.f32.mrb[6].mxu1 }
 0x317   : > { %v2384_v49 = vpack.c.bf16 %v686_v48, %v683_v46  ;;  %v1859_v50 = vpop.f32.mrb[7].mxu1 }
 0x31c   : > { %v725_v51 = vpop.f32.mrb[8].mxu1 }
 0x31d   : > { %v1866_v52 = vpop.f32.mrb[9].mxu1 }
 0x31e   : > { %v728_v53 = vpop.f32.mrb[10].mxu1 }
 0x31f   : > { %v969_v54 = vpack.c.bf16 %v728_v53, %v725_v51  ;;  %v1867_v55 = vpop.f32.mrb[11].mxu1 }
 0x324   : > { %v767_v56 = vpop.f32.mrb[12].mxu1 }
 0x325   : > { %v1874_v57 = vpop.f32.mrb[13].mxu1 }
 0x326   : > { %v770_v58 = vpop.f32.mrb[14].mxu1 }
 0x327   : > { %v1036_v59 = vpack.c.bf16 %v770_v58, %v767_v56  ;;  %v1875_v60 = vpop.f32.mrb[15].mxu1  ;;  %v2169_v58 = vld [vmem:[%s2537_s4] sm:$0xff]  }
 0x329   : > { %1932 = vmatprep.subr.bf16.mxu0 %v1036_v59 }
 0x32a   : > { %1933 = vmatpush3.bf16.msra.mxu0 %v1036_v59 }
 0x32c   : > { %v809_v61 = vpop.f32.mrb[16].mxu1 }
 0x32d   : > { %v1882_v62 = vpop.f32.mrb[17].mxu1 }
 0x32e   : > { %v812_v63 = vpop.f32.mrb[18].mxu1 }
 0x32f   : > { %v1037_v0 = vpack.c.bf16 %v812_v63, %v809_v61  ;;  %v1883_v1 = vpop.f32.mrb[19].mxu1 }
 0x331   : > { %1934 = vmatprep.subr.bf16.mxu0 %v1037_v0 }
 0x332   : > { %1935 = vmatpush3.bf16.msra.mxu0 %v1037_v0 }
 0x334   : > { %v851_v2 = vpop.f32.mrb[20].mxu1 }
 0x335   : > { %v1890_v3 = vpop.f32.mrb[21].mxu1 }
 0x336   : > { %v854_v4 = vpop.f32.mrb[22].mxu1 }
 0x337   : > { %v1087_v5 = vpack.c.bf16 %v854_v4, %v851_v2  ;;  %v1891_v6 = vpop.f32.mrb[23].mxu1 }
 0x339   : > { %1936 = vmatprep.subr.bf16.mxu0 %v1087_v5 }
 0x33a   : > { %1937 = vmatpush3.bf16.msra.mxu0 %v1087_v5 }
 0x33c   : > { %v893_v7 = vpop.f32.mrb[24].mxu1 }
 0x33d   : > { %v1898_v8 = vpop.f32.mrb[25].mxu1 }
 0x33e   : > { %v896_v9 = vpop.f32.mrb[26].mxu1 }
 0x33f   : > { %v1088_v10 = vpack.c.bf16 %v896_v9, %v893_v7  ;;  %v1899_v11 = vpop.f32.mrb[27].mxu1 }
 0x340   : > { %v2170_v11 = vld [vmem:[%s2537_s4 + $0x8] sm:$0xff]  }
 0x341   : > { %1938 = vmatprep.subr.bf16.mxu0 %v1088_v10 }
 0x342   : > { %1939 = vmatpush3.bf16.msra.mxu0 %v1088_v10 }
 0x344   : > { %v935_v12 = vpop.f32.mrb[28].mxu1 }
 0x345   : > { %v1906_v13 = vpop.f32.mrb[29].mxu1  ;;  %1941 = vmatmul.mubr.msk.bf16.vlgmr.msra.gmra.mrb[32].mxu0 %vm980_vm8, %v2168_v19 }
 0x346   : > { %v938_v14 = vpop.f32.mrb[30].mxu1  ;;  %1972 = vmatprep.mubr.bf16.mxu0 %v2169_v58  ;;  %v2172_v13 = vld [vmem:[%s2537_s4 + $0x18] sm:$0xff]  }
 0x347   : > { %v2072_v15 = vpack.i.bf16 %v938_v14, %v935_v12  ;;  %v1138_v16 = vpack.c.bf16 %v938_v14, %v935_v12  ;;  %v1907_v17 = vpop.f32.mrb[31].mxu1  ;;  %v2171_v12 = vld [vmem:[%s2537_s4 + $0x10] sm:$0xff]  }
 0x349   : > { %2073 = vrot.lane.b32.xlu1 %v2072_v15, %s2197_s13 }
 0x383   : > { %v2079_v25 = vpop.permute.xlu0 %2078 }
 0x384   : > { %v2081_v26 = vunpack.i.h.bf16 %v2079_v25  ;;  %v2080_v27 = vunpack.i.l.bf16 %v2079_v25 }
 0x386   : > { %v1689_v29 = vpack.c.bf16 %v2081_v26, %v2080_v27 }
 0x3bb   : > { %v2074_v20 = vpop.permute.xlu1 %2073 }
 0x3bc   : > { %v2076_v21 = vunpack.i.h.bf16 %v2074_v20  ;;  %v2075_v22 = vunpack.i.l.bf16 %v2074_v20 }
 0x3be   : > { %v1680_v24 = vpack.c.bf16 %v2076_v21, %v2075_v22 }
 0x3c0   : > { %1908 = vmatprep.subr.msk.bf16.mxu1 %vm2399_vm9, %v1680_v24 }
 0x3c1   : > { %1909 = vmatpush3.bf16.msk.msra.mxu1 %vm2399_vm9, %v1680_v24 }
 0x3c2   : > { %1910 = vmatprep.subr.bf16.mxu1 %v967_v44 }
 0x3c5   : > { %1911 = vmatpush3.bf16.msra.mxu1 %v967_v44 }
 0x3c6   : > { %1912 = vmatprep.subr.bf16.mxu1 %v2384_v49 }
 0x3c9   : > { %1913 = vmatpush3.bf16.msra.mxu1 %v2384_v49 }
 0x3ca   : > { %1914 = vmatprep.subr.bf16.mxu1 %v969_v54 }
 0x3cd   : > { %1915 = vmatpush3.bf16.msra.mxu1 %v969_v54 }
 0x3ce   : > { %1920 = vmatprep.subr.bf16.mxu1 %v2384_v49 }
 0x3d0   : > { %1917 = vmatmul.mubr.msk.bf16.vlgmr.msra.gmra.mrb[32].mxu1 %vm980_vm8, %v2168_v19 }
 0x3d1   : > { %1921 = vmatpush3.bf16.msra.mxu1 %v2384_v49  ;;  %1928 = vmatprep.mubr.msk.bf16.mxu1 %vm980_vm8, %v2167_v18 }
 0x3d2   : > { %1922 = vmatprep.subr.bf16.mxu1 %v969_v54 }
 0x3d5   : > { %1923 = vmatpush3.bf16.msra.mxu1 %v969_v54 }
 0x3d6   : > { %1924 = vmatprep.subr.bf16.mxu1 %v1036_v59 }
 0x3d9   : > { %1925 = vmatpush3.bf16.msra.mxu1 %v1036_v59 }
 0x3da   : > { %1926 = vmatprep.subr.bf16.mxu1 %v1037_v0 }
 0x3dd   : > { %1927 = vmatpush3.bf16.msra.mxu1 %v1037_v0 }
 0x3de   : > { %1944 = vmatprep.subr.bf16.mxu1 %v1087_v5 }
 0x3e0   : > { %1929 = vmatmul.mubr.msk.bf16.vlgmr.msra.gmra.mrb[36].mxu1 %vm980_vm8, %v2168_v19 }
 0x3e1   : > { %1945 = vmatpush3.bf16.msra.mxu1 %v1087_v5  ;;  %1952 = vmatprep.mubr.msk.bf16.mxu1 %vm980_vm8, %v2167_v18 }
 0x3e2   : > { %1946 = vmatprep.subr.bf16.mxu1 %v1088_v10 }
 0x3e5   : > { %1947 = vmatpush3.bf16.msra.mxu1 %v1088_v10 }
 0x3e6   : > { %1948 = vmatprep.subr.bf16.mxu1 %v1138_v16 }
 0x3e9   : > { %1949 = vmatpush3.bf16.msra.mxu1 %v1138_v16 }
 0x3ea   : > { %1950 = vmatprep.subr.msk.bf16.mxu1 %vm2417_vm10, %v1689_v29 }
 0x3ed   : > { %1951 = vmatpush3.bf16.msk.msra.mxu1 %vm2417_vm10, %v1689_v29 }
 0x3f0   : > { %1953 = vmatmul.mubr.msk.bf16.vlgmr.msra.gmra.mrb[40].mxu1 %vm980_vm8, %v2168_v19 }
 0x3f1   : > { %1996 = vmatprep.mubr.bf16.mxu1 %v2169_v58 }
 0x418   : > { %v1942_v30 = vpop.f32.mrb[32].mxu0 }
 0x419   : > { %v1123_v31 = vpop.f32.mrb[33].mxu0 }
 0x41a   : > { %v1943_v32 = vpop.f32.mrb[34].mxu0 }
 0x41b   : > { %v2426_v33 = vpack.c.bf16 %v1943_v32, %v1942_v30  ;;  %v1126_v34 = vpop.f32.mrb[35].mxu0 }
 0x41c   : > { %v2428_v35 = vpack.c.bf16 %v1126_v34, %v1123_v31 }
 0x4a3   : > { %v1918_v36 = vpop.f32.mrb[32].mxu1 }
 0x4a4   : > { %v1021_v37 = vpop.f32.mrb[33].mxu1 }
 0x4a5   : > { %v1919_v38 = vpop.f32.mrb[34].mxu1 }
 0x4a6   : > { %v2097_v39 = vpack.i.bf16 %v1919_v38, %v1918_v36  ;;  %v2430_v40 = vpack.c.bf16 %v1919_v38, %v1918_v36  ;;  %v1024_v41 = vpop.f32.mrb[35].mxu1 }
 0x4a7   : > { %v2092_v42 = vpack.i.bf16 %v1024_v41, %v1021_v37  ;;  %v1239_v43 = vpack.c.bf16 %v1024_v41, %v1021_v37 }
 0x4b3   : > { %v1930_v44 = vpop.f32.mrb[36].mxu1 }
 0x4b4   : > { %v1072_v45 = vpop.f32.mrb[37].mxu1 }
 0x4b5   : > { %v1931_v46 = vpop.f32.mrb[38].mxu1 }
 0x4b6   : > { %v2432_v47 = vpack.c.bf16 %v1931_v46, %v1930_v44  ;;  %v1075_v48 = vpop.f32.mrb[39].mxu1 }
 0x4b7   : > { %v1241_v49 = vpack.c.bf16 %v1075_v48, %v1072_v45  ;;  %v2497_v45 = vld.sshfl [vmem:[%s2538_s5] sm:$0x11 pattern:$0x75316420] }
 0x4b9   : > { %1980 = vmatprep.subr.bf16.mxu1 %v1241_v49 }
 0x4ba   : > { %1981 = vmatpush3.bf16.msra.mxu1 %v1241_v49 }
 0x4bb   : > { %1982 = vmatprep.subr.bf16.mxu1 %v2432_v47 }
 0x4be   : > { %1983 = vmatpush3.bf16.msra.mxu1 %v2432_v47 }
 0x4bf   : > { %1984 = vmatprep.subr.bf16.mxu1 %v2428_v35 }
 0x4c2   : > { %1985 = vmatpush3.bf16.msra.mxu1 %v2428_v35 }
 0x4c3   : > { %v1954_v50 = vpop.f32.mrb[40].mxu1  ;;  %1986 = vmatprep.subr.bf16.mxu1 %v2426_v33 }
 0x4c4   : > { %v1174_v51 = vpop.f32.mrb[41].mxu1 }
 0x4c5   : > { %v1955_v52 = vpop.f32.mrb[42].mxu1 }
 0x4c6   : > { %v2087_v53 = vpack.i.bf16 %v1955_v52, %v1954_v50  ;;  %v1335_v54 = vpack.c.bf16 %v1955_v52, %v1954_v50  ;;  %v1177_v55 = vpop.f32.mrb[43].mxu1  ;;  %1987 = vmatpush3.bf16.msra.mxu1 %v2426_v33 }
 0x4c7   : > { %v2082_v56 = vpack.i.bf16 %v1177_v55, %v1174_v51  ;;  %v1334_v57 = vpack.c.bf16 %v1177_v55, %v1174_v51 }
 0x4c8   : > { %2088 = vrot.lane.b32.xlu0 %v2087_v53, %s2197_s13 }
 0x4c9   : > { %2083 = vrot.lane.b32.xlu1 %v2082_v56, %s2197_s13  ;;  %1988 = vmatprep.subr.bf16.mxu1 %v1334_v57 }
 0x4ca   : > { %1989 = vmatpush3.bf16.msra.mxu1 %v1334_v57 }
 0x4cb   : > { %1990 = vmatprep.subr.bf16.mxu1 %v1335_v54 }
 0x4cc   : > { %2098 = vrot.lane.b32.xlu0 %v2097_v39, %s2186_s12 }
 0x4cd   : > { %2093 = vrot.lane.b32.xlu1 %v2092_v42, %s2186_s12  ;;  %v1512_v42 = vlaneseq }
 0x4ce   : > { %1991 = vmatpush3.bf16.msra.mxu1 %v1335_v54 }
 0x4cf   : > { %v1513_v44 = vshrl.u32 %v1512_v42, 7 }
 0x53a   : > { %v2089_v59 = vpop.permute.xlu0 %2088 }
 0x53b   : > { %v2091_v60 = vunpack.i.h.bf16 %v2089_v59  ;;  %v2090_v61 = vunpack.i.l.bf16 %v2089_v59  ;;  %v2084_v62 = vpop.permute.xlu1 %2083 }
 0x53c   : > { %v2086_v63 = vunpack.i.h.bf16 %v2084_v62  ;;  %v2085_v0 = vunpack.i.l.bf16 %v2084_v62 }
 0x53d   : > { %v1705_v3 = vpack.c.bf16 %v2091_v60, %v2090_v61 }
 0x53e   : > { %v1700_v1 = vpack.c.bf16 %v2086_v63, %v2085_v0  ;;  %v2099_v2 = vpop.permute.xlu0 %2098 }
 0x53f   : > { %v2094_v4 = vpop.permute.xlu1 %2093  ;;  %v2101_v5 = vunpack.i.h.bf16 %v2099_v2  ;;  %v2100_v6 = vunpack.i.l.bf16 %v2099_v2 }
 0x540   : > { %v2096_v7 = vunpack.i.h.bf16 %v2094_v4  ;;  %v2095_v8 = vunpack.i.l.bf16 %v2094_v4  ;;  %1956 = vmatprep.subr.msk.bf16.mxu0 %vm2399_vm9, %v1700_v1 }
 0x541   : > { %1957 = vmatpush3.bf16.msk.msra.mxu0 %vm2399_vm9, %v1700_v1  ;;  %v1711_v10 = vpack.c.bf16 %v2101_v5, %v2100_v6 }
 0x542   : > { %v1708_v9 = vpack.c.bf16 %v2096_v7, %v2095_v8  ;;  %1958 = vmatprep.subr.msk.bf16.mxu0 %vm2399_vm9, %v1705_v3 }
 0x544   : > { %1992 = vmatprep.subr.msk.bf16.mxu1 %vm2417_vm10, %v1708_v9 }
 0x545   : > { %1959 = vmatpush3.bf16.msk.msra.mxu0 %vm2399_vm9, %v1705_v3  ;;  %1993 = vmatpush3.bf16.msk.msra.mxu1 %vm2417_vm10, %v1708_v9 }
 0x546   : > { %1960 = vmatprep.subr.bf16.mxu0 %v1239_v43  ;;  %1994 = vmatprep.subr.msk.bf16.mxu1 %vm2417_vm10, %v1711_v10 }
 0x549   : > { %1961 = vmatpush3.bf16.msra.mxu0 %v1239_v43  ;;  %1995 = vmatpush3.bf16.msk.msra.mxu1 %vm2417_vm10, %v1711_v10 }
 0x54a   : > { %1962 = vmatprep.subr.bf16.mxu0 %v2430_v40 }
 0x54c   : > { %1997 = vmatmul.mubr.bf16.vlgmr.msra.gmra.mrb[44].mxu1 %v2170_v11 }
 0x54d   : > { %1963 = vmatpush3.bf16.msra.mxu0 %v2430_v40  ;;  %2000 = vmatprep.mubr.bf16.mxu1 %v2171_v12  ;;  %v2199_v40 = vmov 1966171168  }
 0x54e   : > { %1964 = vmatprep.subr.bf16.mxu0 %v1241_v49  ;;  %v1510_v41 = vunpack.c.l.s4 %v2199_v40 }
 0x550   : > { %v1511_v43 = vunpack.c.0.s8 %v1510_v41 }
 0x551   : > { %1965 = vmatpush3.bf16.msra.mxu0 %v1241_v49 }
 0x552   : > { %1966 = vmatprep.subr.bf16.mxu0 %v2432_v47  ;;  %v1514_v48 = vsub.s32 %v1511_v43, %v1513_v44 }
 0x554   : > { %2001 = vmatmul.mubr.bf16.gmra.mrb[48].mxu1 %v2172_v13  ;;  %v1515_v51 = vrot.slane %v2497_v45, %v1514_v48 }
 0x555   : > { %1967 = vmatpush3.bf16.msra.mxu0 %v2432_v47  ;;  %v1508_v47 = vcombine.high %v2497_v45, %v2497_v45 }
 0x556   : > { %1968 = vmatprep.subr.bf16.mxu0 %v2428_v35 }
 0x557   : > { %v1522_v52 = vrot.slane %v1508_v47, %v1514_v48 }
 0x559   : > { %1969 = vmatpush3.bf16.msra.mxu0 %v2428_v35 }
 0x55a   : > { %1970 = vmatprep.subr.bf16.mxu0 %v2426_v33 }
 0x55d   : > { %1971 = vmatpush3.bf16.msra.mxu0 %v2426_v33 }
 0x560   : > { %1973 = vmatmul.mubr.bf16.vlgmr.msra.gmra.mrb[36].mxu0 %v2170_v11 }
 0x561   : > { %1976 = vmatprep.mubr.bf16.mxu0 %v2171_v12 }
 0x568   : > { %1977 = vmatmul.mubr.bf16.gmra.mrb[40].mxu0 %v2172_v13 }
 0x569   : > { %1557 = vmatprep.mubr.bf16.mxu0 %v1522_v52 }
 0x61f   : > { %v1998_v14 = vpop.f32.mrb[44].mxu1 }
 0x620   : > { %v1372_v15 = vpop.f32.mrb[45].mxu1 }
 0x621   : > { %v1999_v16 = vpop.f32.mrb[46].mxu1 }
 0x622   : > { %v2107_v17 = vpack.i.bf16 %v1999_v16, %v1998_v14  ;;  %v1493_v18 = vpack.c.bf16 %v1999_v16, %v1998_v14  ;;  %v1375_v19 = vpop.f32.mrb[47].mxu1 }
 0x623   : > { %v2102_v20 = vpack.i.bf16 %v1375_v19, %v1372_v15  ;;  %v1492_v21 = vpack.c.bf16 %v1375_v19, %v1372_v15 }
 0x624   : > { %2108 = vrot.lane.b32.xlu0 %v2107_v17, %s2197_s13 }
 0x625   : > { %2103 = vrot.lane.b32.xlu1 %v2102_v20, %s2197_s13  ;;  %1822 = vmatprep.subr.bf16.mxu0 %v1492_v21 }
 0x627   : > { %v2002_v22 = vpop.f32.mrb[48].mxu1 }
 0x628   : > { %v1388_v24 = vpop.f32.mrb[49].mxu1 }
 0x629   : > { %v2003_v25 = vpop.f32.mrb[50].mxu1 }
 0x62a   : > { %v2117_v26 = vpack.i.bf16 %v2003_v25, %v2002_v22  ;;  %v1495_v27 = vpack.c.bf16 %v2003_v25, %v2002_v22  ;;  %v1391_v29 = vpop.f32.mrb[51].mxu1 }
 0x62b   : > { %v2112_v30 = vpack.i.bf16 %v1391_v29, %v1388_v24  ;;  %v1494_v31 = vpack.c.bf16 %v1391_v29, %v1388_v24  ;;  %v1565_v29 = vld [vmem:[%s2539_s6] sm:$0x1] }
 0x62c   : > { %2118 = vrot.lane.b32.xlu0 %v2117_v26, %s2197_s13 }
 0x62d   : > { %2113 = vrot.lane.b32.xlu1 %v2112_v30, %s2197_s13  ;;  %s303_s13 = scalar_lea.vmem %s2541_s8, %s2549_s30 }
 0x633   : > { %v2484_v32 = vpop.f32.mrb[36].mxu0 }
 0x634   : > { %v1303_v33 = vpop.f32.mrb[37].mxu0 }
 0x635   : > { %v2486_v34 = vpop.f32.mrb[38].mxu0 }
 0x636   : > { %v2127_v35 = vpack.i.bf16 %v2486_v34, %v2484_v32  ;;  %v1489_v36 = vpack.c.bf16 %v2486_v34, %v2484_v32  ;;  %v1306_v37 = vpop.f32.mrb[39].mxu0 }
 0x637   : > { %v2122_v38 = vpack.i.bf16 %v1306_v37, %v1303_v33  ;;  %v1488_v39 = vpack.c.bf16 %v1306_v37, %v1303_v33 }
 0x638   : > { %2128 = vrot.lane.b32.xlu0 %v2127_v35, %s2186_s12  ;;  %v1571_v35 = vld [vmem:[#allocation2] sm:$0x1] }
 0x639   : > { %2123 = vrot.lane.b32.xlu1 %v2122_v38, %s2186_s12 }
 0x63b   : > { %v1978_v46 = vpop.f32.mrb[40].mxu0 }
 0x63c   : > { %v1319_v49 = vpop.f32.mrb[41].mxu0 }
 0x63d   : > { %v1979_v50 = vpop.f32.mrb[42].mxu0 }
 0x63e   : > { %v2137_v53 = vpack.i.bf16 %v1979_v50, %v1978_v46  ;;  %v1491_v54 = vpack.c.bf16 %v1979_v50, %v1978_v46  ;;  %v1322_v55 = vpop.f32.mrb[43].mxu0 }
 0x63f   : > { %v2132_v56 = vpack.i.bf16 %v1322_v55, %v1319_v49  ;;  %v1490_v57 = vpack.c.bf16 %v1322_v55, %v1319_v49 }
 0x640   : > { %2138 = vrot.lane.b32.xlu0 %v2137_v53, %s2186_s12 }
 0x641   : > { %2133 = vrot.lane.b32.xlu1 %v2132_v56, %s2186_s12 }
 0x696   : > { %v2109_v59 = vpop.permute.xlu0 %2108 }
 0x697   : > { %v2104_v58 = vpop.permute.xlu1 %2103  ;;  %v2111_v63 = vunpack.i.h.bf16 %v2109_v59  ;;  %v2110_v0 = vunpack.i.l.bf16 %v2109_v59 }
 0x698   : > { %v2106_v60 = vunpack.i.h.bf16 %v2104_v58  ;;  %v2105_v61 = vunpack.i.l.bf16 %v2104_v58 }
 0x699   : > { %v1722_v1 = vpack.c.bf16 %v2111_v63, %v2110_v0 }
 0x69a   : > { %v1717_v62 = vpack.c.bf16 %v2106_v60, %v2105_v61 }
 0x69c   : > { %1823 = vmatpush3.bf16.msk.msra.mxu0 %vm2399_vm9, %v1717_v62 }
 0x69d   : > { %1824 = vmatprep.subr.bf16.mxu0 %v1493_v18 }
 0x69e   : > { %v2119_v3 = vpop.permute.xlu0 %2118 }
 0x69f   : > { %v2114_v2 = vpop.permute.xlu1 %2113  ;;  %v2121_v7 = vunpack.i.h.bf16 %v2119_v3  ;;  %v2120_v8 = vunpack.i.l.bf16 %v2119_v3 }
 0x6a0   : > { %v2116_v4 = vunpack.i.h.bf16 %v2114_v2  ;;  %v2115_v5 = vunpack.i.l.bf16 %v2114_v2  ;;  %1825 = vmatpush3.bf16.msk.msra.mxu0 %vm2399_vm9, %v1722_v1 }
 0x6a1   : > { %1826 = vmatprep.subr.bf16.mxu0 %v1494_v31  ;;  %v1732_v9 = vpack.c.bf16 %v2121_v7, %v2120_v8 }
 0x6a2   : > { %v1727_v6 = vpack.c.bf16 %v2116_v4, %v2115_v5 }
 0x6a4   : > { %1827 = vmatpush3.bf16.msk.msra.mxu0 %vm2399_vm9, %v1727_v6 }
 0x6a5   : > { %1828 = vmatprep.subr.bf16.mxu0 %v1495_v27 }
 0x6a8   : > { %1829 = vmatpush3.bf16.msk.msra.mxu0 %vm2399_vm9, %v1732_v9 }
 0x6aa   : > { %v2129_v10 = vpop.permute.xlu0 %2128 }
 0x6ab   : > { %v2124_v11 = vpop.permute.xlu1 %2123  ;;  %v2131_v12 = vunpack.i.h.bf16 %v2129_v10  ;;  %v2130_v13 = vunpack.i.l.bf16 %v2129_v10 }
 0x6ac   : > { %v2126_v14 = vunpack.i.h.bf16 %v2124_v11  ;;  %v2125_v15 = vunpack.i.l.bf16 %v2124_v11 }
 0x6ad   : > { %v1738_v17 = vpack.c.bf16 %v2131_v12, %v2130_v13 }
 0x6ae   : > { %v1735_v16 = vpack.c.bf16 %v2126_v14, %v2125_v15 }
 0x6b0   : > { %1830 = vmatprep.subr.msk.bf16.mxu0 %vm2417_vm10, %v1735_v16 }
 0x6b1   : > { %1831 = vmatpush3.bf16.msra.mxu0 %v1488_v39 }
 0x6b2   : > { %1832 = vmatprep.subr.msk.bf16.mxu0 %vm2417_vm10, %v1738_v17  ;;  %v2139_v18 = vpop.permute.xlu0 %2138 }
 0x6b3   : > { %v2134_v19 = vpop.permute.xlu1 %2133  ;;  %v2141_v20 = vunpack.i.h.bf16 %v2139_v18  ;;  %v2140_v23 = vunpack.i.l.bf16 %v2139_v18 }
 0x6b4   : > { %v2136_v21 = vunpack.i.h.bf16 %v2134_v19  ;;  %v2135_v22 = vunpack.i.l.bf16 %v2134_v19 }
 0x6b5   : > { %1833 = vmatpush3.bf16.msra.mxu0 %v1489_v36  ;;  %v1744_v25 = vpack.c.bf16 %v2141_v20, %v2140_v23 }
 0x6b6   : > { %v1741_v24 = vpack.c.bf16 %v2136_v21, %v2135_v22 }
 0x6b8   : > { %1834 = vmatprep.subr.msk.bf16.mxu0 %vm2417_vm10, %v1741_v24 }
 0x6b9   : > { %1835 = vmatpush3.bf16.msra.mxu0 %v1490_v57 }
 0x6ba   : > { %1836 = vmatprep.subr.msk.bf16.mxu0 %vm2417_vm10, %v1744_v25 }
 0x6bd   : > { %1837 = vmatpush3.bf16.msra.mxu0 %v1491_v54 }
 0x6c0   : > { %1558 = vmatmul.mubr.bf16.vlgmr.msra.gmra.mrb[44].mxu0 %v1515_v51 }
 0x793   : > { %v1838_v26 = vpop.f32.mrb[44].mxu0 }
 0x794   : > { %v1839_v27 = vpop.f32.mrb[45].mxu0 }
 0x795   : > { %v1840_v30 = vadd.f32 %v1839_v27, %v1838_v26  ;;  %v1841_v31 = vpop.f32.mrb[46].mxu0 }
 0x796   : > { %v1842_v32 = vpop.f32.mrb[47].mxu0 }
 0x797   : > { %v1566_v33 = vmul.f32 %v1840_v30, %v1565_v29 }
 0x799   : > { %v1568_v34 = vsel %vm1567_vm11, %v1566_v33, 0.0 }
 0x79a   : > { %1569 = vadd.xlane.f32.xlu1 %v1568_v34 }
 0x827   : > { %v1570_v36 = vpop.xlane.xlu1 %1569 }
 0x828   : > { %v1572_v28 = vadd.f32 %v1571_v35, %v1570_v36 }
 0x82a   : > { %v1746_v37 = vmul.f32 -1.442695, %v1572_v28 }
 0x82c   : > { %2173 = vpow2.f32 %v1746_v37 }
 0x836   : > { %v2174_v38 = vpop.eup %2173 }
 0x837   : > { %v1576_v39 = vadd.f32 1.0, %v2174_v38 }
 0x839   : > { %2175 = vrcp.f32 %v1576_v39 }
 0x843   : > { %v2176_v40 = vpop.eup %2175 }
 0x844   : > { %1580 = vst.msk [vmem:[%s303_s13] sm:$0x1] %vm1579_vm12, %v2176_v40 }
 0x845 PF: > { %s20_s29 = sadd.s32 1, %s2183_s29  }
 0x846   : > { %p17_p4 = scmp.ge.s32.totalorder %s20_s29, 4  }
 0x848   :  { %19 = sbr.rel (!%p17_p4) target bundleno = 3 (0x3), region = 82 }

</bundles_post_ra>
